<compile_context>
chip_gen: v7x
topology: tpu7x:2x2x1
jax: 0.10.0
libtpu: 0.0.40
codegen_flags: <defaults>
</compile_context>

<pallas_src>
import jax
import jax.numpy as jnp
from jax.experimental import pallas as pl
from jax.experimental.pallas import tpu as pltpu


def _round_up(x, m):
    return (x + m - 1) // m * m


def _vmem_capacity_bytes():
    try:
        return int(pltpu.get_tpu_info().vmem_capacity_bytes)
    except Exception:
        return 64 * 1024 * 1024   # conservative default (v7x per-TensorCore VMEM)


def _ffn_kernel(x_ref, w1_ref, b1_ref, w2_ref, a_ref, e_ref, o_ref, acc_ref):
    # x_ref:  (TM, D)   f32   row tile (rows = flattened (b, s)); resident across k axis
    # w1_ref: (D, TH)   bf16  first-linear weight tile (H-tiled along k)
    # b1_ref: (1, TH)   f32
    # w2_ref: (TH, D)   bf16  second-linear weight tile
    # a_ref:  (TM, 1)   f32   per-row BN scale  gamma[s] / sqrt(var[s] + eps)
    # e_ref:  (TM, D)   f32   epilogue  shift[s]*colsum(W2) + b2 (BN shift folded past matmul 2)
    # o_ref:  (TM, D)          output tile (unpadded, no slice pass in the wrapper)
    # acc_ref:(TM, D)   f32   accumulator over the H (k) grid axis
    k = pl.program_id(1)

    @pl.when(k == 0)
    def _():
        acc_ref[...] = jnp.zeros_like(acc_ref)

    # NOTE: contraction K of the first matmul is D; for D < 128/256 the MXU is
    # under-utilized by construction — keep TM large to amortize weight loads.
    xb = x_ref[...].astype(jnp.bfloat16)            # in-kernel cast, hides under the MXU
    h = jnp.dot(xb, w1_ref[...], preferred_element_type=jnp.float32)
    h = jnp.maximum(h + b1_ref[...], 0.0)           # Linear-1 bias + ReLU (f32)
    # Padded H columns of h are exactly 0 (zero-padded w1/b1), and padded rows of w2 are 0.
    acc_ref[...] += jnp.dot(h.astype(jnp.bfloat16), w2_ref[...],
                            preferred_element_type=jnp.float32)

    @pl.when(k == pl.num_programs(1) - 1)
    def _():
        # BN affine moved past matmul 2: (h*a + c) @ W2 + b2 = a*(h@W2) + (c*colsum(W2) + b2).
        # Dropout(eval) == identity.
        o_ref[...] = (a_ref[...] * acc_ref[...] + e_ref[...]).astype(o_ref.dtype)


def _choose_h_tile(D, Hp, budget):
    """H tile TH (multiple of 128 dividing Hp).  Full Hp (single-buffered resident
    weights) if the bf16 weights fit ~1/3 of the budget; otherwise the largest tile
    whose double-buffered weight tiles fit."""
    if 2 * (D * Hp + Hp * D) <= budget // 3:
        return Hp
    cands = [t for t in range(128, Hp, 128) if Hp % t == 0]
    fitting = [t for t in cands if 2 * 2 * (D * t + t * D) <= budget // 3]
    if fitting:
        return max(fitting)
    return min(cands) if cands else Hp


def _vmem_need(TM, TH, D, n_k, out_bytes):
    """Approximate VMEM footprint for one grid step (true buffering counts)."""
    wt_bufs = 1 if n_k == 1 else 2
    weights = wt_bufs * 2 * (D * TH + TH * D)                    # bf16 w1/w2 tiles
    biases = wt_bufs * 4 * TH                                    # f32 b1 tiles
    x_io = 2 * TM * D * 4                                        # f32 x tiles, double-buffered
    o_io = 2 * TM * D * out_bytes                                # out tiles, double-buffered
    live = TM * TH * 4 + TM * TH * 2 + TM * D * 2 + TM * D * 4   # h f32, h bf16, x bf16, acc f32
    resid = TM * 4 + TM * D * 4                                  # BN scale + epilogue (Buffered(1))
    return weights + biases + x_io + o_io + live + resid


def _choose_row_tile(B, S, D, TH, n_k, out_bytes, budget, max_rows):
    """Row tile TM = k*S with k | B so every tile is S-aligned and sees the identical
    per-row BN channel pattern (so the (TM,1)/(TM,D) BN operands stay VMEM-resident),
    satisfying the sublane rule (TM % 8 == 0 or TM == B*S)."""
    M = B * S
    legal = sorted({k * S for k in range(1, B + 1)
                    if B % k == 0 and ((k * S) % 8 == 0 or k * S == M)})
    fitting = [t for t in legal if t <= max_rows
               and _vmem_need(t, TH, D, n_k, out_bytes) <= budget]
    if fitting:
        return max(fitting)
    return min(legal)   # smallest legal tile if nothing under the cap fits the budget


def ffn_forward(x, params, eps=1e-5, target_rows=2048, out_dtype=None):
    """x: (B, S, D) float32.  Returns (B, S, D) eval-mode FFN forward (dtype = out_dtype or x.dtype)."""
    B, S, D = x.shape
    out_dtype = x.dtype if out_dtype is None else jnp.dtype(out_dtype)
    out_bytes = jnp.dtype(out_dtype).itemsize
    w1, b1 = params["w1"], params["b1"]
    w2, b2 = params["w2"], params["b2"]
    gamma, beta = params["gamma"], params["beta"]
    run_mean, run_var = params["running_mean"], params["running_var"]
    H = w1.shape[1]
    M = B * S

    Hp = _round_up(H, 128)          # MXU-friendly hidden dim; the output stays unpadded.

    # Generation-aware VMEM budget (v5e/v6e: 128 MiB, v7x: 64 MiB per TC).
    cap = _vmem_capacity_bytes()
    budget = int(0.70 * cap)        # headroom for Mosaic internal scratch
    vmem_limit = int(0.85 * cap)

    TH = _choose_h_tile(D, Hp, budget)
    n_k = Hp // TH

    # Force >= 2 row steps so v7x megacore sharding and input/output pipelining engage.
    max_rows = min(target_rows, max(S, M // 2))
    TM = _choose_row_tile(B, S, D, TH, n_k, out_bytes, budget, max_rows)
    n_row = M // TM

    # Zero-padded bf16 weights / f32 bias (padded H rows/cols contribute exactly 0).
    w1p = jnp.zeros((D, Hp), jnp.bfloat16).at[:, :H].set(w1.astype(jnp.bfloat16))
    b1p = jnp.zeros((1, Hp), jnp.float32).at[:, :H].set(b1.astype(jnp.float32))
    w2p = jnp.zeros((Hp, D), jnp.bfloat16).at[:H, :].set(w2.astype(jnp.bfloat16))

    # Per-row BN affine (channel = row % S; tiles are S-aligned so a single (TM, ...)
    # copy is VMEM-resident for the whole grid).  The shift is folded past matmul 2:
    #   (h*a + c) @ W2 + b2 = a*(h@W2) + (c*colsum(W2) + b2).
    scale = (gamma / jnp.sqrt(run_var + eps)).astype(jnp.float32)     # (S,)
    shift = (beta - run_mean * scale).astype(jnp.float32)             # (S,)
    reps = TM // S
    a_tile = jnp.tile(scale, reps).reshape(TM, 1)
    c_col = jnp.tile(shift, reps).reshape(TM, 1)
    csum = jnp.sum(w2.astype(jnp.float32), axis=0, keepdims=True)     # (1, D)
    e_tile = c_col * csum + b2.astype(jnp.float32)[None, :]           # (TM, D)

    x_rows = x.reshape(M, D)   # no wrapper-side dtype cast: bf16 cast happens in-kernel

    res_mode = pl.Buffered(1)                                  # constant-index operands
    wt_mode = pl.Buffered(1) if n_k == 1 else pl.Buffered(2)   # weights resident iff one H tile

    flops = 4 * M * D * Hp
    bytes_accessed = (M * D * 4                                   # x (f32)
                      + M * D * out_bytes                         # output
                      + 2 * (D * Hp + Hp * D) * (1 if n_k == 1 else n_row)   # bf16 weights
                      + (Hp + TM * (1 + D) + D) * 4)              # b1 + BN affine / epilogue

    out_rows = pl.pallas_call(
        _ffn_kernel,
        out_shape=jax.ShapeDtypeStruct((M, D), out_dtype),
        grid_spec=pltpu.PrefetchScalarGridSpec(
            num_scalar_prefetch=0,
            grid=(n_row, n_k),
            in_specs=[
                pl.BlockSpec((TM, D), lambda i, k: (i, 0)),                         # x rows
                pl.BlockSpec((D, TH), lambda i, k: (0, k), pipeline_mode=wt_mode),  # w1
                pl.BlockSpec((1, TH), lambda i, k: (0, k), pipeline_mode=wt_mode),  # b1
                pl.BlockSpec((TH, D), lambda i, k: (k, 0), pipeline_mode=wt_mode),  # w2
                pl.BlockSpec((TM, 1), lambda i, k: (0, 0), pipeline_mode=res_mode), # BN scale
                pl.BlockSpec((TM, D), lambda i, k: (0, 0), pipeline_mode=res_mode), # epilogue
            ],
            out_specs=pl.BlockSpec((TM, D), lambda i, k: (i, 0)),
            scratch_shapes=[pltpu.VMEM((TM, D), jnp.float32)],
        ),
        compiler_params=pltpu.CompilerParams(
            dimension_semantics=("parallel", "arbitrary"),   # rows independent, H reduced
            vmem_limit_bytes=vmem_limit,
        ),
        cost_estimate=pl.CostEstimate(
            flops=flops, transcendentals=0, bytes_accessed=bytes_accessed),
    )(x_rows, w1p, b1p, w2p, a_tile, e_tile)

    return out_rows.reshape(B, S, D)


def make_params(key, state_size, forward_expansion, bn_size):
    D = state_size
    H = forward_expansion * state_size
    ks = jax.random.split(key, 8)
    return {
        "w1": jax.random.normal(ks[0], (D, H), jnp.float32) * 0.05,
        "b1": jax.random.normal(ks[1], (H,), jnp.float32) * 0.01,
        "w2": jax.random.normal(ks[2], (H, D), jnp.float32) * 0.05,
        "b2": jax.random.normal(ks[3], (D,), jnp.float32) * 0.01,
        "gamma": 1.0 + 0.1 * jax.random.normal(ks[4], (bn_size,), jnp.float32),
        "beta": 0.1 * jax.random.normal(ks[5], (bn_size,), jnp.float32),
        "running_mean": 0.1 * jax.random.normal(ks[6], (bn_size,), jnp.float32),
        "running_var": jnp.abs(1.0 + 0.1 * jax.random.normal(ks[7], (bn_size,), jnp.float32)),
    }


def ffn_reference(x, params, eps=1e-5):
    """Pure-JAX f32 reference mirroring PyTorch eval-mode forward."""
    h = jnp.maximum(x @ params["w1"] + params["b1"], 0.0)
    scale = params["gamma"] / jnp.sqrt(params["running_var"] + eps)
    shift = params["beta"] - params["running_mean"] * scale
    h = h * scale[None, :, None] + shift[None, :, None]
    return h @ params["w2"] + params["b2"]


if __name__ == "__main__":
    # Small shapes consistent with FFN: batch=2, seq(bn_size)=8, state_size=32.
    B, S, D = 2, 8, 32
    FORWARD_EXPANSION = 1

    key = jax.random.PRNGKey(0)
    kx, kp = jax.random.split(key)
    x = jax.random.normal(kx, (B, S, D), jnp.float32)
    params = make_params(kp, state_size=D, forward_expansion=FORWARD_EXPANSION, bn_size=S)

    out = ffn_forward(x, params)
    out = jax.block_until_ready(out)

    ref = ffn_reference(x, params)
    assert out.shape == (B, S, D)
    assert out.dtype == x.dtype
    # Precision contract: bf16 matmul operands with f32 accumulation -> relaxed tolerance
    # vs the pure-f32 reference.
    assert jnp.allclose(out, ref, atol=2e-2, rtol=2e-2), "mismatch vs reference"

    print("KERNEL_OK")
</pallas_src>

<mosaic_0001>
module attributes {stable_mosaic.version = 11 : i64} {
  func.func @_ffn_kernel(%arg0: i32, %arg1: i32, %arg2: memref<8x32xf32, #tpu.memory_space<vmem>>, %arg3: memref<32x128xbf16, #tpu.memory_space<vmem>>, %arg4: memref<1x128xf32, #tpu.memory_space<vmem>>, %arg5: memref<128x32xbf16, #tpu.memory_space<vmem>>, %arg6: memref<8x1xf32, #tpu.memory_space<vmem>>, %arg7: memref<8x32xf32, #tpu.memory_space<vmem>>, %arg8: memref<8x32xf32, #tpu.memory_space<vmem>>, %arg9: memref<8x32xf32, #tpu.memory_space<vmem>>) attributes {dimension_semantics = [#tpu.dimension_semantics<parallel>, #tpu.dimension_semantics<arbitrary>], iteration_bounds = array<i64: 2, 1>, scalar_prefetch = 0 : i64, scratch_operands = 1 : i64, tpu.core_type = #tpu.core_type<tc>, window_params = [{transform_indices = @transform_0, window_bounds = array<i64: 8, 32>}, {pipeline_mode = #tpu.pipeline_mode<synchronous>, transform_indices = @transform_1, window_bounds = array<i64: 32, 128>}, {pipeline_mode = #tpu.pipeline_mode<synchronous>, transform_indices = @transform_2, window_bounds = array<i64: 1, 128>}, {pipeline_mode = #tpu.pipeline_mode<synchronous>, transform_indices = @transform_3, window_bounds = array<i64: 128, 32>}, {pipeline_mode = #tpu.pipeline_mode<synchronous>, transform_indices = @transform_4, window_bounds = array<i64: 8, 1>}, {pipeline_mode = #tpu.pipeline_mode<synchronous>, transform_indices = @transform_5, window_bounds = array<i64: 8, 32>}, {transform_indices = @transform_6, window_bounds = array<i64: 8, 32>}]} {
    %c0_i32 = arith.constant 0 : i32
    %0 = arith.cmpi eq, %arg1, %c0_i32 : i32
    %1 = arith.extui %0 : i1 to i32
    %c0_i32_0 = arith.constant 0 : i32
    %2 = arith.cmpi ne, %1, %c0_i32_0 : i32
    scf.if %2 {
      %cst_16 = arith.constant 0.000000e+00 : f32
      %21 = vector.broadcast %cst_16 : f32 to vector<8x32xf32>
      %c0_17 = arith.constant 0 : index
      %c0_18 = arith.constant 0 : index
      %22 = vector.load %arg9[%c0_17, %c0_18] : memref<8x32xf32, #tpu.memory_space<vmem>>, vector<8x32xf32>
      tpu.vector_store %arg9[%c0_17, %c0_18], %21 {strides = array<i32>} : memref<8x32xf32, #tpu.memory_space<vmem>>, vector<8x32xf32>,
    } else {
    }
    %c0 = arith.constant 0 : index
    %c0_1 = arith.constant 0 : index
    %3 = vector.load %arg2[%c0, %c0_1] : memref<8x32xf32, #tpu.memory_space<vmem>>, vector<8x32xf32>
    %4 = arith.truncf %3 : vector<8x32xf32> to vector<8x32xbf16>
    %c0_2 = arith.constant 0 : index
    %c0_3 = arith.constant 0 : index
    %5 = vector.load %arg3[%c0_2, %c0_3] : memref<32x128xbf16, #tpu.memory_space<vmem>>, vector<32x128xbf16>
    %cst = arith.constant dense<0.000000e+00> : vector<8x128xf32>
    %6 = tpu.matmul %4, %5, %cst {dimension_numbers = #tpu.dot_dimension_numbers<[1], [0], [0], [1], [0, 0, 1, 1], [], []>} : vector<8x32xbf16>, vector<32x128xbf16>, vector<8x128xf32> -> vector<8x128xf32>
    %c0_4 = arith.constant 0 : index
    %c0_5 = arith.constant 0 : index
    %7 = vector.load %arg4[%c0_4, %c0_5] : memref<1x128xf32, #tpu.memory_space<vmem>>, vector<1x128xf32>
    %8 = vector.broadcast %7 : vector<1x128xf32> to vector<8x128xf32>
    %9 = arith.addf %6, %8 : vector<8x128xf32>
    %cst_6 = arith.constant 0.000000e+00 : f32
    %10 = vector.broadcast %cst_6 : f32 to vector<8x128xf32>
    %11 = arith.maximumf %9, %10 : vector<8x128xf32>
    %c0_7 = arith.constant 0 : index
    %c0_8 = arith.constant 0 : index
    %12 = vector.load %arg9[%c0_7, %c0_8] : memref<8x32xf32, #tpu.memory_space<vmem>>, vector<8x32xf32>
    %13 = arith.truncf %11 : vector<8x128xf32> to vector<8x128xbf16>
    %c0_9 = arith.constant 0 : index
    %c0_10 = arith.constant 0 : index
    %14 = vector.load %arg5[%c0_9, %c0_10] : memref<128x32xbf16, #tpu.memory_space<vmem>>, vector<128x32xbf16>
    %cst_11 = arith.constant dense<0.000000e+00> : vector<8x32xf32>
    %15 = tpu.matmul %13, %14, %cst_11 {dimension_numbers = #tpu.dot_dimension_numbers<[1], [0], [0], [1], [0, 0, 1, 1], [], []>} : vector<8x128xbf16>, vector<128x32xbf16>, vector<8x32xf32> -> vector<8x32xf32>
    %16 = arith.addf %12, %15 : vector<8x32xf32>
    %c0_12 = arith.constant 0 : index
    %c0_13 = arith.constant 0 : index
    %17 = vector.load %arg9[%c0_12, %c0_13] : memref<8x32xf32, #tpu.memory_space<vmem>>, vector<8x32xf32>
    tpu.vector_store %arg9[%c0_12, %c0_13], %16 {strides = array<i32>} : memref<8x32xf32, #tpu.memory_space<vmem>>, vector<8x32xf32>,
    %c0_i32_14 = arith.constant 0 : i32
    %18 = arith.cmpi eq, %arg1, %c0_i32_14 : i32
    %19 = arith.extui %18 : i1 to i32
    %c0_i32_15 = arith.constant 0 : i32
    %20 = arith.cmpi ne, %19, %c0_i32_15 : i32
    scf.if %20 {
      %c0_16 = arith.constant 0 : index
      %c0_17 = arith.constant 0 : index
      %21 = vector.load %arg6[%c0_16, %c0_17] : memref<8x1xf32, #tpu.memory_space<vmem>>, vector<8x1xf32>
      %c0_18 = arith.constant 0 : index
      %c0_19 = arith.constant 0 : index
      %22 = vector.load %arg9[%c0_18, %c0_19] : memref<8x32xf32, #tpu.memory_space<vmem>>, vector<8x32xf32>
      %23 = vector.broadcast %21 : vector<8x1xf32> to vector<8x32xf32>
      %24 = arith.mulf %23, %22 : vector<8x32xf32>
      %c0_20 = arith.constant 0 : index
      %c0_21 = arith.constant 0 : index
      %25 = vector.load %arg7[%c0_20, %c0_21] : memref<8x32xf32, #tpu.memory_space<vmem>>, vector<8x32xf32>
      %26 = arith.addf %24, %25 : vector<8x32xf32>
      %c0_22 = arith.constant 0 : index
      %c0_23 = arith.constant 0 : index
      %27 = vector.load %arg8[%c0_22, %c0_23] : memref<8x32xf32, #tpu.memory_space<vmem>>, vector<8x32xf32>
      tpu.vector_store %arg8[%c0_22, %c0_23], %26 {strides = array<i32>} : memref<8x32xf32, #tpu.memory_space<vmem>>, vector<8x32xf32>,
    } else {
    }
    return
  }
  func.func @transform_0(%arg0: i32, %arg1: i32) -> (i32, i32) {
    %c0_i32 = arith.constant 0 : i32
    %c0_i32_0 = arith.constant 0 : i32
    return %arg0, %c0_i32 : i32, i32
  }
  func.func @transform_1(%arg0: i32, %arg1: i32) -> (i32, i32) {
    %c0_i32 = arith.constant 0 : i32
    %c0_i32_0 = arith.constant 0 : i32
    return %c0_i32, %arg1 : i32, i32
  }
  func.func @transform_2(%arg0: i32, %arg1: i32) -> (i32, i32) {
    %c0_i32 = arith.constant 0 : i32
    %c0_i32_0 = arith.constant 0 : i32
    return %c0_i32, %arg1 : i32, i32
  }
  func.func @transform_3(%arg0: i32, %arg1: i32) -> (i32, i32) {
    %c0_i32 = arith.constant 0 : i32
    %c0_i32_0 = arith.constant 0 : i32
    return %arg1, %c0_i32 : i32, i32
  }
  func.func @transform_4(%arg0: i32, %arg1: i32) -> (i32, i32) {
    %c0_i32 = arith.constant 0 : i32
    %c0_i32_0 = arith.constant 0 : i32
    %c0_i32_1 = arith.constant 0 : i32
    return %c0_i32, %c0_i32_0 : i32, i32
  }
  func.func @transform_5(%arg0: i32, %arg1: i32) -> (i32, i32) {
    %c0_i32 = arith.constant 0 : i32
    %c0_i32_0 = arith.constant 0 : i32
    %c0_i32_1 = arith.constant 0 : i32
    return %c0_i32, %c0_i32_0 : i32, i32
  }
  func.func @transform_6(%arg0: i32, %arg1: i32) -> (i32, i32) {
    %c0_i32 = arith.constant 0 : i32
    %c0_i32_0 = arith.constant 0 : i32
    return %arg0, %c0_i32 : i32, i32
  }
}

</mosaic_0001>

<bundles_post_ra>
// kernel: tpu_custom_call.1
= control target key start
LH: loop header
LB: loop body
LE: loop exit
PB: predicated region body
PF: predicated region fallthrough
CT: control target
= control target key end

     0   :  { %11 = vsyncpa [#allocation4], 0  ;;  %s1043_s0 = inlined_call_operand.vmem [shape: f32[16,32], index: 0, kind: input, shape index: {}]   ;;  %s1044_s1 = inlined_call_operand.vmem [shape: bf16[32,128], index: 1, kind: input, shape index: {}]   ;;  %s1045_s2 = inlined_call_operand.vmem [shape: f32[1,128], index: 2, kind: input, shape index: {}]   ;;  %s1046_s3 = inlined_call_operand.vmem [shape: bf16[128,32], index: 3, kind: input, shape index: {}]   ;;  %s1047_s4 = inlined_call_operand.vmem [shape: f32[8,1], index: 4, kind: input, shape index: {}]   ;;  %s1048_s5 = inlined_call_operand.vmem [shape: f32[8,32], index: 5, kind: input, shape index: {}]   ;;  %s1049_s6 = inlined_call_operand.hbm [shape: f32[16,32], index: 6, kind: output, shape index: {}]  }
   0x1   :  { %13 = vsyncpa [#allocation4 + $0x1], 0  ;;  %s888_s21 = smov 0   ;;  %s890_s22 = smov 0  }
   0x2   :  { %s892_s23 = smov 0   ;;  %s894_s24 = smov 0  }
   0x3   :  { %s896_s25 = smov 0   ;;  %s898_s26 = smov 0  }
   0x4 LB: > { %s634_s27 = sadd.s32 4294967295, %s847_s26   ;;  %s635_s28 = sadd.s32 4294967294, %s847_s26   ;;  %s847_s26 = sphi %s898_s26, %s19_s26   ;;  %s843_s25 = sphi %s896_s25, %s1056_s25   ;;  %s839_s24 = sphi %s894_s24, %s1055_s24   ;;  %s835_s23 = sphi %s892_s23, %s1054_s23   ;;  %s831_s22 = sphi %s890_s22, %s1053_s22   ;;  %s827_s21 = sphi %s888_s21, %s1052_s21  }
   0x5   : > { %s31_s29 = sadd.s32 1, %s843_s25  ;;  %s184_s30 = sadd.s32 1, %s835_s23 }
   0x6   : > { %p33_p0 = scmp.ge.s32.totalorder %s31_s29, 2  ;;  %p194_p1 = scmp.ne.s32.totalorder %s835_s23, %s831_s22 }
   0x7   : > { %p195_p2 = scmp.eq.s32.totalorder %s634_s27, 1  ;;  %p200_p3 = scmp.ne.s32.totalorder %s831_s22, %s827_s21 }
   0x8   : > { %s1058_s29 = smov (%p33_p0, %s31_s29), 0  ;;  %p201_p5 = scmp.eq.s32.totalorder %s635_s28, 1 }
   0x9   : > { %p928_p4 = por %p195_p2, %p194_p1  ;;  %s181_s8 = ssub.s32 %s843_s25, %s1058_s29 }
   0xa   : > { %p641_p6 = scmp.ge.s32.totalorder %s847_s26, 1  ;;  %p182_p7 = scmp.eq.s32.totalorder %s181_s8, 0 }
   0xb   : > { %p935_p8 = por %p201_p5, %p200_p3  ;;  %p254_p9 = scmp.lt.s32.totalorder %s847_s26, 3 }
   0xc   : > { %s941_s10 = scalar_select %p182_p7, %s835_s23, %s184_s30  }
   0xd   : > { %p255_p10 = pnand %p641_p6, %p254_p9 }
   0xe   : > { %v759_v0 = vld [vmem:[%s1044_s1] sm:$0xff] (!%p255_p10)   ;;  %v849_v1 = vmov (!%p255_p10), 0.0   ;;  %v760_v2 = vld [vmem:[%s1044_s1 + $0x8] sm:$0xff] (!%p255_p10)   ;;  %vm850_vm0 = vmmov (!%p255_p10), 0   ;;  %p295_p11 = scmp.lt.s32.totalorder (!%p255_p10), %s839_s24, 1  ;;  %vm317_vm1 = vcmask (!%p255_p10), 261120  }
   0xf   : > { %258 = sbr.rel (%p255_p10) target bundleno = 487 (0x1e7), region = 44  ;;  %672 = vmatprep.subr.bf16.mxu0 (!%p255_p10), %v849_v1  ;;  %680 = vmatprep.subr.bf16.mxu1 (!%p255_p10), %v849_v1  ;;  %318 = vst.msk [vmem:[#allocation2] sm:$0xff] (!%p255_p10), %vm317_vm1, %v849_v1  ;;  %v761_v3 = vld [vmem:[%s1046_s3] sm:$0xff] (!%p255_p10)   ;;  %v762_v4 = vld [vmem:[%s1046_s3 + $0x8] sm:$0xff] (!%p255_p10)   ;;  %v763_v6 = vld [vmem:[%s1046_s3 + $0x10] sm:$0xff] (!%p255_p10)   ;;  %v851_v14 = vmov (!%p255_p10), 0  }
  0x10   : > { %673 = vmatpush3.bf16.msra.mxu0 (!%p255_p10), %v759_v0  ;;  %676 = vmatprep.mubr.msk.bf16.mxu0 (!%p255_p10), %vm850_vm0, %v849_v1  ;;  %v764_v8 = vld [vmem:[%s1046_s3 + $0x18] sm:$0xff] (!%p255_p10)   ;;  %v765_v9 = vld [vmem:[%s1046_s3 + $0x20] sm:$0xff] (!%p255_p10)   ;;  %v766_v10 = vld [vmem:[%s1046_s3 + $0x28] sm:$0xff] (!%p255_p10)   ;;  %s292_s12 = sand.u32 (!%p255_p10), 1, %s831_s22   ;;  %s657_s16 = sshll.u32 (!%p255_p10), %s839_s24, 7 }
  0x11   : > { %674 = vmatprep.subr.bf16.mxu0 (!%p255_p10), %v849_v1  ;;  %696 = vmatprep.mubr.msk.bf16.mxu1 (!%p255_p10), %vm850_vm0, %v849_v1  ;;  %v767_v11 = vld [vmem:[%s1046_s3 + $0x30] sm:$0xff] (!%p255_p10)   ;;  %v768_v12 = vld [vmem:[%s1046_s3 + $0x38] sm:$0xff] (!%p255_p10)   ;;  %v500_v13 = vld [vmem:[%s1047_s4] sm:$0xff] (!%p255_p10)  ;;  %s642_s13 = sshll.u32 (!%p255_p10), %s292_s12, 3  ;;  %s995_s27 = scalar_lea.hbm (!%p255_p10), %s1049_s6, %s657_s16 }
  0x12   : > { %681 = vmatpush3.bf16.msra.mxu1 (!%p255_p10), %v761_v3  ;;  %758 = vset.pattern.permute.xlu0 (!%p255_p10), %v851_v14  ;;  %v644_v15 = vld [vmem:[%s1045_s2] ss:$0 sm:$0xff] (!%p255_p10)  ;;  %s512_s28 = scalar_lea.sflag (!%p255_p10), [#allocation4], %s292_s12 }
  0x13   : > { %682 = vmatprep.subr.bf16.mxu1 (!%p255_p10), %v849_v1  ;;  %504 = vperm.xlu0 (!%p255_p10), %758, %v500_v13   ;;  %v508_v30 = vld [vmem:[%s1048_s5] sm:$0xff] (!%p255_p10) }
  0x14   : > { %675 = vmatpush3.bf16.msra.mxu0 (!%p255_p10), %v760_v2 }
  0x16   : > { %s296_s17 = scalar_select %p295_p11, %s839_s24, 1  ;;  %683 = vmatpush3.bf16.msra.mxu1 %v762_v4  ;;  %v389_v23 = vld [vmem:[#allocation2] sm:$0xff] }
  0x17   : > { %684 = vmatprep.subr.bf16.mxu1 %v849_v1  ;;  %s852_s24 = smov [#allocation3]  }
  0x18   : > { %s643_s20 = sshll.u32 %s296_s17, 3  ;;  %s294_s17 = scalar_lea.vmem [#allocation3], %s642_s13 }
  0x19   : > { %s298_s30 = scalar_lea.vmem %s1043_s0, %s643_s20  ;;  %s525_s18 = sshll.u32 %s294_s17, 4  ;;  %s997_s18 = int_to_ptr.vmem [resolvable:$true] %s525_s18 }
  0x1a   : > { %v319_v5 = vld [vmem:[%s298_s30] sm:$0xff]  ;;  %685 = vmatpush3.bf16.msra.mxu1 %v763_v6  ;;  %s769_s30 = scalar_lea.vmem %s997_s18, 128  ;;  %s773_s8 = sshll.u32 %s852_s24, 4  ;;  %s774_s8 = int_to_ptr.vmem [resolvable:$false] %s773_s8 }
  0x1b   : > { %v320_v7 = vpack.c.bf16 %v319_v5, %v319_v5  ;;  %686 = vmatprep.subr.bf16.mxu1 %v849_v1  ;;  %p770_p12 = scmp.ne.s32.totalorder %s997_s18, %s769_s30  ;;  %s775_s11 = scalar_lea.vmem %s774_s8, 256 }
  0x1c   : > { %p776_p1 = scmp.lt.s32.totalorder %s997_s18, %s774_s8  ;;  %p777_p2 = scmp.lt.s32.totalorder %s775_s11, %s769_s30 }
  0x1d   : > { %677 = vmatmul.mubr.msk.bf16.vlgmr.msra.gmra.mrb[0].mxu0 %vm317_vm1, %v320_v7  ;;  %p771_p13 = pnand %p770_p12, %p928_p4 }
  0x1e   : > { %687 = vmatpush3.bf16.msra.mxu1 %v764_v8  ;;  %p778_p3 = por %p777_p2, %p776_p1 }
  0x1f   : > { %688 = vmatprep.subr.bf16.mxu1 %v849_v1  ;;  %p772_p0 = pneg %p771_p13 }
  0x21   : > { %p779_p5 = pnand %p778_p3, %p772_p0 }
  0x22   : > { %689 = vmatpush3.bf16.msra.mxu1 %v765_v9 }
  0x23   : > { %690 = vmatprep.subr.bf16.mxu1 %v849_v1 }
  0x26   : > { %691 = vmatpush3.bf16.msra.mxu1 %v766_v10 }
  0x27   : > { %692 = vmatprep.subr.bf16.mxu1 %v849_v1 }
  0x2a   : > { %693 = vmatpush3.bf16.msra.mxu1 %v767_v11 }
  0x2b   : > { %694 = vmatprep.subr.bf16.mxu1 %v849_v1 }
  0x2e   : > { %695 = vmatpush3.bf16.msra.mxu1 %v768_v12 }
  0x92   : > { %v505_v29 = vpop.permute.xlu0 %504 }
  0xf0   : > { %v382_v16 = vpop.f32.mrb[0].mxu0 }
  0xf1   : > { %v383_v17 = vadd.f32 %v644_v15, %v382_v16  ;;  %v678_v18 = vpop.f32.mrb[1].mxu0 }
  0xf2   : > { %v385_v19 = vpop.f32.mrb[2].mxu0 }
  0xf3   : > { %v388_v20 = vmax.f32 %v383_v17, 0.0  ;;  %v679_v21 = vpop.f32.mrb[3].mxu0 }
  0xf5   : > { %v390_v22 = vpack.c.bf16 %v388_v20, %v388_v20 }
  0xf7   : > { %697 = vmatmul.mubr.bf16.vlgmr.msra.gmra.mrb[0].mxu1 %v390_v22 }
 0x1ca   : > { %v489_v24 = vpop.f32.mrb[0].mxu1 }
 0x1cb   : > { %v495_v25 = vadd.f32 %v489_v24, %v389_v23  ;;  %v698_v26 = vpop.f32.mrb[1].mxu1 }
 0x1cc   : > { %v492_v27 = vpop.f32.mrb[2].mxu1 }
 0x1cd   : > { %496 = vst.msk [vmem:[#allocation2] sm:$0xff] %vm317_vm1, %v495_v25  ;;  %v699_v28 = vpop.f32.mrb[3].mxu1 }
 0x1d4   : > { %v501_v31 = vld [vmem:[#allocation2] sm:$0xff] }
 0x1d5   : > { %v507_v32 = vmul.f32 %v505_v29, %v501_v31 }
 0x1d7   : > { %v509_v33 = vadd.f32 %v508_v30, %v507_v32 }
 0x1d9   : > { %510 = vst.msk [vmem:[%s294_s17] sm:$0xff] %vm317_vm1, %v509_v33 }
 0x1da   : > { %782 = shalt.err (!%p779_p5)
}
 0x1db   : > { %s783_s12 = scalar_lea.hbm %s995_s27, 128  ;;  %s787_s15 = scalar_lea.hbm %s1049_s6, 256 }
 0x1dc   : > { %p784_p6 = scmp.ne.s32.totalorder %s995_s27, %s783_s12  ;;  %p788_p10 = scmp.lt.u32.totalorder %s995_s27, %s1049_s6 }
 0x1dd   : > { %p789_p11 = scmp.lt.u32.totalorder %s787_s15, %s783_s12  ;;  %p791_p13 = scmp.lt.u32.totalorder %s783_s12, %s995_s27 }
 0x1de   : > { %p785_p7 = pnand %p784_p6, %p928_p4 }
 0x1df   : > { %p790_p12 = por %p789_p11, %p788_p10 }
 0x1e0   : > { %p786_p9 = pneg %p785_p7 }
 0x1e1   : > { %p792_p0 = por %p791_p13, %p790_p12 }
 0x1e3   : > { %p793_p1 = pnand %p792_p0, %p786_p9 }
 0x1e5   : > { %796 = shalt.err (!%p793_p1)
}
 0x1e6   : > { %700 = dma.vmem_to_hbm [thread:$0]  (%p928_p4), %s997_s18, 128, %s995_s27, %s512_s28  }
 0x1e7 PF: > { %p706_p2 = scmp.ge.s32.totalorder %s847_s26, 2  ;;  %s537_s19 = sand.u32 1, %s827_s21  }
 0x1e8   : > { %s538_s20 = scalar_lea.sflag [#allocation4], %s537_s19 }
 0x1e9   : > { %p703_p3 = pnand %p706_p2, %p935_p8 }
 0x1eb   : > { %822 = dma.done.wait (!%p703_p3), %s538_s20, 128  }
 0x1ec   : > { %824 = vsyncadd (!%p703_p3), %s538_s20, 4294967168  ;;  %s19_s26 = sadd.s32 1, %s847_s26   ;;  %s1052_s21 = smov %s831_s22 }
 0x1ed   : > { %p16_p5 = scmp.ge.s32.totalorder %s19_s26, 4   ;;  %s1053_s22 = smov %s835_s23 }
 0x1ee   : > { %s1054_s23 = smov %s941_s10  ;;  %s1055_s24 = smov %s843_s25 }
 0x1ef   : > { %s1056_s25 = smov %s1058_s29  ;;  %18 = sbr.rel (!%p16_p5) target bundleno = 4 (0x4), region = 96 }
 0x1f6   :  { %543 = vsyncpa [#allocation4], 1 }
 0x1f7   :  { %545 = vsyncpa [#allocation4 + $0x1], 1 }

</bundles_post_ra>
